<compile_context>
chip_gen: v7x
topology: tpu7x:2x2x1
jax: 0.10.0
libtpu: 0.0.40
codegen_flags: <defaults>
</compile_context>

<pallas_src>
import functools

import numpy as np
import jax
import jax.numpy as jnp
from jax.experimental import pallas as pl
from jax.experimental.pallas import tpu as pltpu

EPS = 1e-5
MOMENTUM = 0.99

_TARGET_TILE_BYTES = 8 * 1024 * 1024     # per-grid-step tile target (both paths)
_RESIDENT_MAX_BATCH = 64                 # in-kernel channel fold unrolls over N


# ----------------------------------------------------------------------------
# Hardware budgets
# ----------------------------------------------------------------------------
@functools.lru_cache(maxsize=None)
def _budgets():
    """(vmem_limit_bytes, resident_path_max_input_bytes) for this TPU generation."""
    phys = 64 * 1024 * 1024              # conservative fallback (v7x-sized)
    try:
        info = pltpu.get_tpu_info()
        phys = int(getattr(info, "vmem_capacity_bytes", phys))
    except Exception:
        pass
    vmem_limit = (phys * 3) // 4         # 96 MiB on 128 MiB parts, 48 MiB on v7x
    resident_max = (phys * 5) // 16      # ~40 MiB on 128 MiB parts, ~20 MiB on v7x
    return vmem_limit, resident_max


def _round_up(v, q):
    return (v + q - 1) // q * q


def _pick_tile(dim, quantum, max_tile):
    """Largest multiple of `quantum` dividing `dim`, capped at `max_tile`.

    Wrappers pre-pad dims to a multiple of `quantum`, so a divisor always
    exists (at worst `quantum` itself)."""
    if dim <= max_tile:
        return dim
    t = (max_tile // quantum) * quantum
    while t >= quantum:
        if dim % t == 0:
            return t
        t -= quantum
    return dim


# ----------------------------------------------------------------------------
# Kernels
# ----------------------------------------------------------------------------
def _stretch_resident_kernel(x_ref, gamma_ref, beta_ref, mmag_ref, mmin_ref,
                             y_ref, nmag_ref, nmin_ref,
                             rmin_ref, rmax_ref,
                             *, alpha, eps, momentum,
                             n_batch, n_chan, hw_tile, num_hw_tiles):
    """Resident path: x streamed in HW tiles, y resident, single pallas_call.

    x_ref:   (R, hw_tile) current tile (R = N*C, rows sublane-dense)
    y_ref:   (R, Mp) resident output block (holds a copy of x until epilogue)
    gamma/beta/mmag/mmin: (C, 1);  nmag/nmin: (C, 1) outputs
    rmin/rmax: (R, 1) f32 VMEM scratch accumulators
    """
    t = pl.program_id(0)

    @pl.when(t == 0)
    def _():
        rmin_ref[...] = jnp.full(rmin_ref.shape, jnp.inf, dtype=jnp.float32)
        rmax_ref[...] = jnp.full(rmax_ref.shape, -jnp.inf, dtype=jnp.float32)

    x = x_ref[...]
    xf = x.astype(jnp.float32)
    rmin_ref[...] = jnp.minimum(rmin_ref[...],
                                jnp.min(xf, axis=1, keepdims=True))
    rmax_ref[...] = jnp.maximum(rmax_ref[...],
                                jnp.max(xf, axis=1, keepdims=True))

    # Stash the tile into the resident output; the epilogue rewrites it in place.
    off = pl.multiple_of(t * hw_tile, hw_tile)
    y_ref[:, pl.ds(off, hw_tile)] = x

    @pl.when(t == pl.num_programs(0) - 1)
    def _():
        # Fold per-row stats over the batch -> per-channel (C, 1).
        ch_min = rmin_ref[pl.ds(0, n_chan), :]
        ch_max = rmax_ref[pl.ds(0, n_chan), :]
        for n in range(1, n_batch):
            ch_min = jnp.minimum(ch_min, rmin_ref[pl.ds(n * n_chan, n_chan), :])
            ch_max = jnp.maximum(ch_max, rmax_ref[pl.ds(n * n_chan, n_chan), :])
        mag = ch_max - ch_min
        inv = 1.0 / (mag + eps)                       # exact; only C divides
        scale_c = gamma_ref[...] * (alpha * inv)      # (C, 1)
        bias_c = beta_ref[...] - scale_c * ch_min     # (C, 1)
        nmag_ref[...] = momentum * mmag_ref[...] + (1.0 - momentum) * mag
        nmin_ref[...] = momentum * mmin_ref[...] + (1.0 - momentum) * ch_min

        # Per-row scale/bias (rows are batch-major, channel-minor).
        scale_r = jnp.concatenate([scale_c] * n_batch, axis=0)   # (R, 1)
        bias_r = jnp.concatenate([bias_c] * n_batch, axis=0)     # (R, 1)

        # Rewrite the resident output tile by tile (pure VPU FMA over VMEM).
        for tt in range(num_hw_tiles):
            sl = pl.ds(tt * hw_tile, hw_tile)
            xv = y_ref[:, sl].astype(jnp.float32)
            y_ref[:, sl] = (scale_r * xv + bias_r).astype(y_ref.dtype)


def _row_minmax_kernel(x_ref, rmin_ref, rmax_ref):
    """Tiled pass 1: per-row (= per (n, c)) min/max, accumulated over HW tiles."""
    @pl.when(pl.program_id(1) == 0)
    def _():
        rmin_ref[...] = jnp.full(rmin_ref.shape, jnp.inf, dtype=jnp.float32)
        rmax_ref[...] = jnp.full(rmax_ref.shape, -jnp.inf, dtype=jnp.float32)

    x = x_ref[...].astype(jnp.float32)
    rmin_ref[...] = jnp.minimum(rmin_ref[...],
                                jnp.min(x, axis=1, keepdims=True))
    rmax_ref[...] = jnp.maximum(rmax_ref[...],
                                jnp.max(x, axis=1, keepdims=True))


def _apply_affine_kernel(x_ref, scale_ref, bias_ref, y_ref):
    """Tiled pass 2: y = scale * x + bias (per-row scale/bias, lane broadcast)."""
    y_ref[...] = (scale_ref[...] * x_ref[...].astype(jnp.float32)
                  + bias_ref[...]).astype(y_ref.dtype)


# ----------------------------------------------------------------------------
# Wrappers
# ----------------------------------------------------------------------------
def _stretch_resident(x, alpha, gamma, beta, moving_mag, moving_min,
                      *, vmem_limit, target_tile_bytes):
    N, C, H, W = x.shape
    M = H * W
    R = N * C
    itemsize = x.dtype.itemsize

    x2 = x.reshape(R, M)                           # free reshape, no transpose
    Mp = _round_up(M, 128)
    if Mp != M:
        x2 = jnp.pad(x2, ((0, 0), (0, Mp - M)), mode="edge")   # min/max safe

    hw_cap = max(128, (target_tile_bytes // max(R * itemsize, 1)) // 128 * 128)
    hw_tile = _pick_tile(Mp, 128, hw_cap)
    num_tiles = Mp // hw_tile

    g = gamma.reshape(C, 1).astype(jnp.float32)
    b = beta.reshape(C, 1).astype(jnp.float32)
    mm = moving_mag.reshape(C, 1).astype(jnp.float32)
    mn = moving_min.reshape(C, 1).astype(jnp.float32)

    kernel = functools.partial(
        _stretch_resident_kernel, alpha=float(alpha), eps=EPS,
        momentum=MOMENTUM, n_batch=N, n_chan=C, hw_tile=hw_tile,
        num_hw_tiles=num_tiles)

    small = lambda: pl.BlockSpec((C, 1), lambda t: (0, 0))
    y2, new_mag, new_min = pl.pallas_call(
        kernel,
        out_shape=(jax.ShapeDtypeStruct((R, Mp), x.dtype),
                   jax.ShapeDtypeStruct((C, 1), jnp.float32),
                   jax.ShapeDtypeStruct((C, 1), jnp.float32)),
        grid=(num_tiles,),
        in_specs=[pl.BlockSpec((R, hw_tile), lambda t: (0, t)),
                  small(), small(), small(), small()],
        out_specs=(pl.BlockSpec((R, Mp), lambda t: (0, 0)),
                   small(), small()),
        scratch_shapes=[pltpu.VMEM((R, 1), jnp.float32),
                        pltpu.VMEM((R, 1), jnp.float32)],
        compiler_params=pltpu.CompilerParams(
            dimension_semantics=("arbitrary",),
            vmem_limit_bytes=vmem_limit),
    )(x2, g, b, mm, mn)

    y = y2[:, :M].reshape(N, C, H, W)
    return (y,
            new_mag.reshape(1, C, 1, 1).astype(moving_mag.dtype),
            new_min.reshape(1, C, 1, 1).astype(moving_min.dtype))


def _stretch_tiled(x, alpha, gamma, beta, moving_mag, moving_min,
                   *, vmem_limit, target_tile_bytes):
    N, C, H, W = x.shape
    M = H * W
    R = N * C
    itemsize = x.dtype.itemsize
    sub_q = max(8, 32 // itemsize)                 # 8 for f32, 16 for bf16

    x2 = x.reshape(R, M)                           # free reshape (NCHW contiguous)
    Mp = _round_up(M, 128)
    Rp = _round_up(R, sub_q)
    if Mp != M or Rp != R:
        # Edge replication keeps per-row min/max intact; padded rows/lanes are
        # sliced off the outputs below.
        x2 = jnp.pad(x2, ((0, Rp - R), (0, Mp - M)), mode="edge")

    # Row tile: keep >=2 row blocks whenever possible so both v7x TensorCores
    # participate in pass 1 (no-op on single-core v5e/v6e).
    row_cap = 512
    if Rp >= 2 * sub_q:
        row_cap = min(row_cap, (Rp // 2) // sub_q * sub_q)
    row_tile = _pick_tile(Rp, sub_q, row_cap)
    hw_cap = max(128, (target_tile_bytes // (row_tile * itemsize)) // 128 * 128)
    hw_tile = _pick_tile(Mp, 128, hw_cap)
    grid = (Rp // row_tile, Mp // hw_tile)

    # ---- pass 1: per-row min / max (accumulators resident in VMEM) ---------
    row_min, row_max = pl.pallas_call(
        _row_minmax_kernel,
        out_shape=(jax.ShapeDtypeStruct((Rp, 1), jnp.float32),
                   jax.ShapeDtypeStruct((Rp, 1), jnp.float32)),
        grid=grid,
        in_specs=[pl.BlockSpec((row_tile, hw_tile), lambda r, t: (r, t))],
        out_specs=(pl.BlockSpec((row_tile, 1), lambda r, t: (r, 0)),
                   pl.BlockSpec((row_tile, 1), lambda r, t: (r, 0))),
        compiler_params=pltpu.CompilerParams(
            dimension_semantics=("parallel", "arbitrary"),
            vmem_limit_bytes=vmem_limit),
    )(x2)

    # ---- O(C) per-channel math (negligible next to the streaming passes) ---
    ch_min = jnp.min(row_min[:R].reshape(N, C), axis=0)        # (C,)
    ch_max = jnp.max(row_max[:R].reshape(N, C), axis=0)        # (C,)
    mag = ch_max - ch_min
    inv = 1.0 / (mag + EPS)
    scale_c = gamma.reshape(C).astype(jnp.float32) * (float(alpha) * inv)
    bias_c = beta.reshape(C).astype(jnp.float32) - scale_c * ch_min
    new_mag = MOMENTUM * moving_mag.reshape(C) + (1.0 - MOMENTUM) * mag
    new_min = MOMENTUM * moving_min.reshape(C) + (1.0 - MOMENTUM) * ch_min

    scale_r = jnp.broadcast_to(scale_c[None, :], (N, C)).reshape(R, 1)
    bias_r = jnp.broadcast_to(bias_c[None, :], (N, C)).reshape(R, 1)
    if Rp != R:
        scale_r = jnp.pad(scale_r, ((0, Rp - R), (0, 0)), mode="edge")
        bias_r = jnp.pad(bias_r, ((0, Rp - R), (0, 0)), mode="edge")

    # ---- pass 2: y = scale * x + bias (pure FMA stream, megacore-parallel) -
    y2 = pl.pallas_call(
        _apply_affine_kernel,
        out_shape=jax.ShapeDtypeStruct((Rp, Mp), x.dtype),
        grid=grid,
        in_specs=[pl.BlockSpec((row_tile, hw_tile), lambda r, t: (r, t)),
                  pl.BlockSpec((row_tile, 1), lambda r, t: (r, 0)),
                  pl.BlockSpec((row_tile, 1), lambda r, t: (r, 0))],
        out_specs=pl.BlockSpec((row_tile, hw_tile), lambda r, t: (r, t)),
        compiler_params=pltpu.CompilerParams(
            dimension_semantics=("parallel", "parallel"),
            vmem_limit_bytes=vmem_limit),
    )(x2, scale_r, bias_r)

    y = y2[:R, :M].reshape(N, C, H, W)
    return (y,
            new_mag.reshape(1, C, 1, 1).astype(moving_mag.dtype),
            new_min.reshape(1, C, 1, 1).astype(moving_min.dtype))


def stretch_forward(x, alpha, gamma, beta, moving_mag, moving_min,
                    force_path=None, target_tile_bytes=_TARGET_TILE_BYTES):
    """Training-mode Stretch forward.

    x: (N, C, H, W); alpha: Python float;
    gamma/beta/moving_mag/moving_min: (1, C, 1, 1).
    Returns (Y, new_moving_mag, new_moving_min).
    """
    assert x.ndim == 4, "Stretch Pallas kernel implements the NCHW (num_dims=4) case"
    vmem_limit, resident_max = _budgets()
    nbytes = x.size * x.dtype.itemsize
    N = x.shape[0]

    path = force_path
    if path is None:
        # Resident path: 2x HBM traffic; tiled path: 3x. Prefer resident
        # whenever the whole tensor fits the generation's VMEM budget and the
        # in-kernel batch fold stays small.
        if nbytes <= resident_max and N <= _RESIDENT_MAX_BATCH:
            path = "resident"
        else:
            path = "tiled"

    if path == "resident":
        return _stretch_resident(x, alpha, gamma, beta, moving_mag, moving_min,
                                 vmem_limit=vmem_limit,
                                 target_tile_bytes=target_tile_bytes)
    return _stretch_tiled(x, alpha, gamma, beta, moving_mag, moving_min,
                          vmem_limit=vmem_limit,
                          target_tile_bytes=target_tile_bytes)


def stretch_reference(x, alpha, gamma, beta, moving_mag, moving_min):
    """Pure-JAX reference of the same semantics (sanity check)."""
    x_min = jnp.min(x, axis=(0, 2, 3), keepdims=True)
    x_max = jnp.max(x, axis=(0, 2, 3), keepdims=True)
    mag = x_max - x_min
    x_hat = (x - x_min) / (mag + EPS)
    y = gamma * (alpha * x_hat) + beta
    new_mag = MOMENTUM * moving_mag + (1.0 - MOMENTUM) * mag
    new_min = MOMENTUM * moving_min + (1.0 - MOMENTUM) * x_min
    return y, new_mag, new_min


def _check(got, want):
    for g, w in zip(got, want):
        np.testing.assert_allclose(np.asarray(g), np.asarray(w),
                                   rtol=1e-5, atol=1e-5)


if __name__ == "__main__":
    # Module config: num_features=4, num_dims=4 (NCHW), alpha = 2*pi
    C = 4
    alpha = float(2.0 * np.pi)

    # Deterministic parameter init (matches __init__ of the torch module)
    gamma = 0.01 * jnp.ones((1, C, 1, 1), dtype=jnp.float32)
    beta = float(np.pi) * jnp.ones((1, C, 1, 1), dtype=jnp.float32)
    moving_mag = 1.0 * jnp.ones((1, C, 1, 1), dtype=jnp.float32)
    moving_min = float(np.pi) * jnp.ones((1, C, 1, 1), dtype=jnp.float32)

    key = jax.random.PRNGKey(0)
    k1, k2, k3 = jax.random.split(key, 3)

    # (a) typical module shape -> resident path, single tile -----------------
    x_small = jax.random.normal(k1, (2, C, 16, 16), dtype=jnp.float32)
    out = stretch_forward(x_small, alpha, gamma, beta, moving_mag, moving_min)
    jax.block_until_ready(out)
    _check(out, stretch_reference(x_small, alpha, gamma, beta,
                                  moving_mag, moving_min))

    # (b) resident path, forced multi-tile (stash + epilogue loop) -----------
    x_big = jax.random.normal(k2, (8, C, 32, 64), dtype=jnp.float32)
    out = stretch_forward(x_big, alpha, gamma, beta, moving_mag, moving_min,
                          force_path="resident", target_tile_bytes=4096)
    jax.block_until_ready(out)
    ref_big = stretch_reference(x_big, alpha, gamma, beta,
                                moving_mag, moving_min)
    _check(out, ref_big)

    # (c) tiled two-pass path, forced multi-block grid (rows + HW tiles) -----
    out = stretch_forward(x_big, alpha, gamma, beta, moving_mag, moving_min,
                          force_path="tiled", target_tile_bytes=4096)
    jax.block_until_ready(out)
    _check(out, ref_big)

    # (d) ragged spatial extent (exercises the edge-padding path) ------------
    x_odd = jax.random.normal(k3, (2, C, 15, 17), dtype=jnp.float32)
    ref_odd = stretch_reference(x_odd, alpha, gamma, beta,
                                moving_mag, moving_min)
    out = stretch_forward(x_odd, alpha, gamma, beta, moving_mag, moving_min)
    jax.block_until_ready(out)
    _check(out, ref_odd)
    out = stretch_forward(x_odd, alpha, gamma, beta, moving_mag, moving_min,
                          force_path="tiled")
    jax.block_until_ready(out)
    _check(out, ref_odd)

    print("KERNEL_OK")
</pallas_src>

<mosaic_0001>
module attributes {stable_mosaic.version = 11 : i64} {
  func.func @_stretch_resident_kernel(%arg0: i32, %arg1: memref<8x256xf32, #tpu.memory_space<vmem>>, %arg2: memref<4x1xf32, #tpu.memory_space<vmem>>, %arg3: memref<4x1xf32, #tpu.memory_space<vmem>>, %arg4: memref<4x1xf32, #tpu.memory_space<vmem>>, %arg5: memref<4x1xf32, #tpu.memory_space<vmem>>, %arg6: memref<8x256xf32, #tpu.memory_space<vmem>>, %arg7: memref<4x1xf32, #tpu.memory_space<vmem>>, %arg8: memref<4x1xf32, #tpu.memory_space<vmem>>, %arg9: memref<8x1xf32, #tpu.memory_space<vmem>>, %arg10: memref<8x1xf32, #tpu.memory_space<vmem>>) attributes {dimension_semantics = [#tpu.dimension_semantics<arbitrary>], iteration_bounds = array<i64: 1>, scalar_prefetch = 0 : i64, scratch_operands = 2 : i64, tpu.core_type = #tpu.core_type<tc>, window_params = [{transform_indices = @transform_0, window_bounds = array<i64: 8, 256>}, {pipeline_mode = #tpu.pipeline_mode<synchronous>, transform_indices = @transform_1, window_bounds = array<i64: 4, 1>}, {pipeline_mode = #tpu.pipeline_mode<synchronous>, transform_indices = @transform_2, window_bounds = array<i64: 4, 1>}, {pipeline_mode = #tpu.pipeline_mode<synchronous>, transform_indices = @transform_3, window_bounds = array<i64: 4, 1>}, {pipeline_mode = #tpu.pipeline_mode<synchronous>, transform_indices = @transform_4, window_bounds = array<i64: 4, 1>}, {pipeline_mode = #tpu.pipeline_mode<synchronous>, transform_indices = @transform_5, window_bounds = array<i64: 8, 256>}, {pipeline_mode = #tpu.pipeline_mode<synchronous>, transform_indices = @transform_6, window_bounds = array<i64: 4, 1>}, {pipeline_mode = #tpu.pipeline_mode<synchronous>, transform_indices = @transform_7, window_bounds = array<i64: 4, 1>}]} {
    %c0_i32 = arith.constant 0 : i32
    %0 = arith.cmpi eq, %arg0, %c0_i32 : i32
    %1 = arith.extui %0 : i1 to i32
    %c0_i32_0 = arith.constant 0 : i32
    %2 = arith.cmpi ne, %1, %c0_i32_0 : i32
    scf.if %2 {
      %cst_14 = arith.constant 0x7F800000 : f32
      %21 = vector.broadcast %cst_14 : f32 to vector<8x1xf32>
      %c0_15 = arith.constant 0 : index
      %c0_16 = arith.constant 0 : index
      %22 = vector.load %arg9[%c0_15, %c0_16] : memref<8x1xf32, #tpu.memory_space<vmem>>, vector<8x1xf32>
      tpu.vector_store %arg9[%c0_15, %c0_16], %21 {strides = array<i32>} : memref<8x1xf32, #tpu.memory_space<vmem>>, vector<8x1xf32>,
      %cst_17 = arith.constant 0xFF800000 : f32
      %23 = vector.broadcast %cst_17 : f32 to vector<8x1xf32>
      %c0_18 = arith.constant 0 : index
      %c0_19 = arith.constant 0 : index
      %24 = vector.load %arg10[%c0_18, %c0_19] : memref<8x1xf32, #tpu.memory_space<vmem>>, vector<8x1xf32>
      tpu.vector_store %arg10[%c0_18, %c0_19], %23 {strides = array<i32>} : memref<8x1xf32, #tpu.memory_space<vmem>>, vector<8x1xf32>,
    } else {
    }
    %c0 = arith.constant 0 : index
    %c0_1 = arith.constant 0 : index
    %3 = vector.load %arg1[%c0, %c0_1] : memref<8x256xf32, #tpu.memory_space<vmem>>, vector<8x256xf32>
    %c0_2 = arith.constant 0 : index
    %c0_3 = arith.constant 0 : index
    %4 = vector.load %arg9[%c0_2, %c0_3] : memref<8x1xf32, #tpu.memory_space<vmem>>, vector<8x1xf32>
    %cst = arith.constant dense<0x7F800000> : vector<8xf32>
    %5 = vector.multi_reduction <minimumf>, %3, %cst [1] : vector<8x256xf32> to vector<8xf32>
    %6 = vector.shape_cast %5 : vector<8xf32> to vector<8x1xf32>
    %7 = arith.minimumf %4, %6 : vector<8x1xf32>
    %c0_4 = arith.constant 0 : index
    %c0_5 = arith.constant 0 : index
    %8 = vector.load %arg9[%c0_4, %c0_5] : memref<8x1xf32, #tpu.memory_space<vmem>>, vector<8x1xf32>
    tpu.vector_store %arg9[%c0_4, %c0_5], %7 {strides = array<i32>} : memref<8x1xf32, #tpu.memory_space<vmem>>, vector<8x1xf32>,
    %c0_6 = arith.constant 0 : index
    %c0_7 = arith.constant 0 : index
    %9 = vector.load %arg10[%c0_6, %c0_7] : memref<8x1xf32, #tpu.memory_space<vmem>>, vector<8x1xf32>
    %cst_8 = arith.constant dense<0xFF800000> : vector<8xf32>
    %10 = vector.multi_reduction <maximumf>, %3, %cst_8 [1] : vector<8x256xf32> to vector<8xf32>
    %11 = vector.shape_cast %10 : vector<8xf32> to vector<8x1xf32>
    %12 = arith.maximumf %9, %11 : vector<8x1xf32>
    %c0_9 = arith.constant 0 : index
    %c0_10 = arith.constant 0 : index
    %13 = vector.load %arg10[%c0_9, %c0_10] : memref<8x1xf32, #tpu.memory_space<vmem>>, vector<8x1xf32>
    tpu.vector_store %arg10[%c0_9, %c0_10], %12 {strides = array<i32>} : memref<8x1xf32, #tpu.memory_space<vmem>>, vector<8x1xf32>,
    %c256_i32 = arith.constant 256 : i32
    %14 = arith.muli %arg0, %c256_i32 : i32
    %15 = tpu.assume_multiple %14, 256 : i32
    %c0_11 = arith.constant 0 : index
    %16 = arith.index_cast %15 : i32 to index
    %17 = vector.load %arg6[%c0_11, %16] : memref<8x256xf32, #tpu.memory_space<vmem>>, vector<8x256xf32>
    tpu.vector_store %arg6[%c0_11, %16], %3 {strides = array<i32>} : memref<8x256xf32, #tpu.memory_space<vmem>>, vector<8x256xf32>,
    %c0_i32_12 = arith.constant 0 : i32
    %18 = arith.cmpi eq, %arg0, %c0_i32_12 : i32
    %19 = arith.extui %18 : i1 to i32
    %c0_i32_13 = arith.constant 0 : i32
    %20 = arith.cmpi ne, %19, %c0_i32_13 : i32
    scf.if %20 {
      %c0_14 = arith.constant 0 : index
      %c0_15 = arith.constant 0 : index
      %21 = vector.load %arg9[%c0_14, %c0_15] : memref<8x1xf32, #tpu.memory_space<vmem>>, vector<4x1xf32>
      %c0_16 = arith.constant 0 : index
      %c0_17 = arith.constant 0 : index
      %22 = vector.load %arg10[%c0_16, %c0_17] : memref<8x1xf32, #tpu.memory_space<vmem>>, vector<4x1xf32>
      %c4 = arith.constant 4 : index
      %c0_18 = arith.constant 0 : index
      %23 = vector.load %arg9[%c4, %c0_18] : memref<8x1xf32, #tpu.memory_space<vmem>>, vector<4x1xf32>
      %24 = arith.minimumf %21, %23 : vector<4x1xf32>
      %c4_19 = arith.constant 4 : index
      %c0_20 = arith.constant 0 : index
      %25 = vector.load %arg10[%c4_19, %c0_20] : memref<8x1xf32, #tpu.memory_space<vmem>>, vector<4x1xf32>
      %26 = arith.maximumf %22, %25 : vector<4x1xf32>
      %27 = arith.subf %26, %24 : vector<4x1xf32>
      %cst_21 = arith.constant 9.99999974E-6 : f32
      %28 = vector.broadcast %cst_21 : f32 to vector<4x1xf32>
      %29 = arith.addf %27, %28 : vector<4x1xf32>
      %cst_22 = arith.constant 1.000000e+00 : f32
      %30 = vector.broadcast %cst_22 : f32 to vector<4x1xf32>
      %31 = arith.divf %30, %29 : vector<4x1xf32>
      %c0_23 = arith.constant 0 : index
      %c0_24 = arith.constant 0 : index
      %32 = vector.load %arg2[%c0_23, %c0_24] : memref<4x1xf32, #tpu.memory_space<vmem>>, vector<4x1xf32>
      %cst_25 = arith.constant 6.28318548 : f32
      %33 = vector.broadcast %cst_25 : f32 to vector<4x1xf32>
      %34 = arith.mulf %33, %31 : vector<4x1xf32>
      %35 = arith.mulf %32, %34 : vector<4x1xf32>
      %c0_26 = arith.constant 0 : index
      %c0_27 = arith.constant 0 : index
      %36 = vector.load %arg3[%c0_26, %c0_27] : memref<4x1xf32, #tpu.memory_space<vmem>>, vector<4x1xf32>
      %37 = arith.mulf %35, %24 : vector<4x1xf32>
      %38 = arith.subf %36, %37 : vector<4x1xf32>
      %c0_28 = arith.constant 0 : index
      %c0_29 = arith.constant 0 : index
      %39 = vector.load %arg4[%c0_28, %c0_29] : memref<4x1xf32, #tpu.memory_space<vmem>>, vector<4x1xf32>
      %cst_30 = arith.constant 9.900000e-01 : f32
      %40 = vector.broadcast %cst_30 : f32 to vector<4x1xf32>
      %41 = arith.mulf %40, %39 : vector<4x1xf32>
      %cst_31 = arith.constant 0.00999999977 : f32
      %42 = vector.broadcast %cst_31 : f32 to vector<4x1xf32>
      %43 = arith.mulf %42, %27 : vector<4x1xf32>
      %44 = arith.addf %41, %43 : vector<4x1xf32>
      %c0_32 = arith.constant 0 : index
      %c0_33 = arith.constant 0 : index
      %45 = vector.load %arg7[%c0_32, %c0_33] : memref<4x1xf32, #tpu.memory_space<vmem>>, vector<4x1xf32>
      tpu.vector_store %arg7[%c0_32, %c0_33], %44 {strides = array<i32>} : memref<4x1xf32, #tpu.memory_space<vmem>>, vector<4x1xf32>,
      %c0_34 = arith.constant 0 : index
      %c0_35 = arith.constant 0 : index
      %46 = vector.load %arg5[%c0_34, %c0_35] : memref<4x1xf32, #tpu.memory_space<vmem>>, vector<4x1xf32>
      %cst_36 = arith.constant 9.900000e-01 : f32
      %47 = vector.broadcast %cst_36 : f32 to vector<4x1xf32>
      %48 = arith.mulf %47, %46 : vector<4x1xf32>
      %cst_37 = arith.constant 0.00999999977 : f32
      %49 = vector.broadcast %cst_37 : f32 to vector<4x1xf32>
      %50 = arith.mulf %49, %24 : vector<4x1xf32>
      %51 = arith.addf %48, %50 : vector<4x1xf32>
      %c0_38 = arith.constant 0 : index
      %c0_39 = arith.constant 0 : index
      %52 = vector.load %arg8[%c0_38, %c0_39] : memref<4x1xf32, #tpu.memory_space<vmem>>, vector<4x1xf32>
      tpu.vector_store %arg8[%c0_38, %c0_39], %51 {strides = array<i32>} : memref<4x1xf32, #tpu.memory_space<vmem>>, vector<4x1xf32>,
      %53 = tpu.concatenate %35, %35 in 0 : vector<4x1xf32>, vector<4x1xf32> -> vector<8x1xf32>
      %54 = tpu.concatenate %38, %38 in 0 : vector<4x1xf32>, vector<4x1xf32> -> vector<8x1xf32>
      %c0_40 = arith.constant 0 : index
      %c0_41 = arith.constant 0 : index
      %55 = vector.load %arg6[%c0_40, %c0_41] : memref<8x256xf32, #tpu.memory_space<vmem>>, vector<8x256xf32>
      %56 = vector.broadcast %53 : vector<8x1xf32> to vector<8x256xf32>
      %57 = arith.mulf %56, %55 : vector<8x256xf32>
      %58 = vector.broadcast %54 : vector<8x1xf32> to vector<8x256xf32>
      %59 = arith.addf %57, %58 : vector<8x256xf32>
      %c0_42 = arith.constant 0 : index
      %c0_43 = arith.constant 0 : index
      %60 = vector.load %arg6[%c0_42, %c0_43] : memref<8x256xf32, #tpu.memory_space<vmem>>, vector<8x256xf32>
      tpu.vector_store %arg6[%c0_42, %c0_43], %59 {strides = array<i32>} : memref<8x256xf32, #tpu.memory_space<vmem>>, vector<8x256xf32>,
    } else {
    }
    return
  }
  func.func @transform_0(%arg0: i32) -> (i32, i32) {
    %c0_i32 = arith.constant 0 : i32
    %c0_i32_0 = arith.constant 0 : i32
    return %c0_i32, %arg0 : i32, i32
  }
  func.func @transform_1(%arg0: i32) -> (i32, i32) {
    %c0_i32 = arith.constant 0 : i32
    %c0_i32_0 = arith.constant 0 : i32
    %c0_i32_1 = arith.constant 0 : i32
    return %c0_i32, %c0_i32_0 : i32, i32
  }
  func.func @transform_2(%arg0: i32) -> (i32, i32) {
    %c0_i32 = arith.constant 0 : i32
    %c0_i32_0 = arith.constant 0 : i32
    %c0_i32_1 = arith.constant 0 : i32
    return %c0_i32, %c0_i32_0 : i32, i32
  }
  func.func @transform_3(%arg0: i32) -> (i32, i32) {
    %c0_i32 = arith.constant 0 : i32
    %c0_i32_0 = arith.constant 0 : i32
    %c0_i32_1 = arith.constant 0 : i32
    return %c0_i32, %c0_i32_0 : i32, i32
  }
  func.func @transform_4(%arg0: i32) -> (i32, i32) {
    %c0_i32 = arith.constant 0 : i32
    %c0_i32_0 = arith.constant 0 : i32
    %c0_i32_1 = arith.constant 0 : i32
    return %c0_i32, %c0_i32_0 : i32, i32
  }
  func.func @transform_5(%arg0: i32) -> (i32, i32) {
    %c0_i32 = arith.constant 0 : i32
    %c0_i32_0 = arith.constant 0 : i32
    %c0_i32_1 = arith.constant 0 : i32
    return %c0_i32, %c0_i32_0 : i32, i32
  }
  func.func @transform_6(%arg0: i32) -> (i32, i32) {
    %c0_i32 = arith.constant 0 : i32
    %c0_i32_0 = arith.constant 0 : i32
    %c0_i32_1 = arith.constant 0 : i32
    return %c0_i32, %c0_i32_0 : i32, i32
  }
  func.func @transform_7(%arg0: i32) -> (i32, i32) {
    %c0_i32 = arith.constant 0 : i32
    %c0_i32_0 = arith.constant 0 : i32
    %c0_i32_1 = arith.constant 0 : i32
    return %c0_i32, %c0_i32_0 : i32, i32
  }
}

</mosaic_0001>

<bundles_post_ra>
// kernel: tpu_custom_call.1
= control target key start
LH: loop header
LB: loop body
LE: loop exit
PB: predicated region body
PF: predicated region fallthrough
CT: control target
= control target key end

     0   :  { %s246_s0 = inlined_call_operand.vmem [shape: f32[8,256], index: 0, kind: input, shape index: {}]   ;;  %s247_s1 = inlined_call_operand.vmem [shape: f32[4,1], index: 1, kind: input, shape index: {}]   ;;  %s248_s2 = inlined_call_operand.vmem [shape: f32[4,1], index: 2, kind: input, shape index: {}]   ;;  %s249_s3 = inlined_call_operand.vmem [shape: f32[4,1], index: 3, kind: input, shape index: {}]   ;;  %s250_s4 = inlined_call_operand.vmem [shape: f32[4,1], index: 4, kind: input, shape index: {}]   ;;  %s251_s5 = inlined_call_operand.hbm [shape: f32[8,256], index: 5, kind: output, shape index: {0}]   ;;  %s252_s6 = inlined_call_operand.vmem [shape: f32[4,1], index: 6, kind: output, shape index: {1}]   ;;  %s253_s7 = inlined_call_operand.vmem [shape: f32[4,1], index: 7, kind: output, shape index: {2}]  }
   0x1   :  { %v31_v0 = vld [vmem:[%s246_s0] sm:$0xff]  ;;  %v32_v1 = vld [vmem:[%s246_s0 + $0x8] sm:$0xff] }
   0x2   :  { %13 = vsyncpa [#allocation5], 0  ;;  %v34_v2 = vmin.f32 %v31_v0, %v32_v1  ;;  %v41_v3 = vmax.f32 %v31_v0, %v32_v1  ;;  %vm28_vm0 = vcmask 7168   ;;  %v166_v4 = vmov inf   ;;  %v78_v13 = vld [vmem:[%s250_s4] sm:$0xf] }
   0x3   :  { %29 = vst.msk [vmem:[#allocation2] sm:$0xff] %vm28_vm0, %v166_v4  ;;  %v167_v5 = vmov -inf   ;;  %v168_v6 = vmov 0   ;;  %v79_v17 = vmul.f32 0.99, %v78_v13  ;;  %vm76_vm1 = vcmask 3072  }
   0x4   :  { %35 = vmin.xlane.f32.xlu0 %v34_v2  ;;  %30 = vst.msk [vmem:[#allocation3] sm:$0xff] %vm28_vm0, %v167_v5  ;;  %138 = vset.pattern.permute.xlu1 %v168_v6  ;;  %v72_v21 = vld [vmem:[%s249_s3] sm:$0xf]  ;;  %vm86_vm2 = vcmask 1043456  }
   0x5   :  { %139 = vset.pattern.permute.xlu0 %v168_v6  ;;  %v73_v25 = vmul.f32 0.99, %v72_v21  ;;  %v66_v30 = vld [vmem:[%s247_s1] sm:$0xf] }
   0x6   :  { %v69_v33 = vld [vmem:[%s248_s2] sm:$0xf] }
   0x8   :  { %42 = vmax.xlane.f32.xlu0 %v41_v3 }
   0xa   :  { %v33_v7 = vld [vmem:[#allocation2] sm:$0xff] }
   0xb   :  { %v40_v10 = vld [vmem:[#allocation3] sm:$0xff] }
  0x91   :  { %v36_v8 = vpop.xlane.xlu0 %35 }
  0x92   :  { %v37_v9 = vmin.f32 %v33_v7, %v36_v8 }
  0x94   :  { %39 = vst.msk [vmem:[#allocation2] sm:$0xff] %vm28_vm0, %v37_v9 }
  0x95   :  { %v43_v11 = vpop.xlane.xlu0 %42 }
  0x96   :  { %v44_v12 = vmax.f32 %v40_v10, %v43_v11 }
  0x98   :  { %45 = vst.msk [vmem:[#allocation3] sm:$0xff] %vm28_vm0, %v44_v12 }
  0x9b   :  { %v56_v14 = vld [vmem:[#allocation2] sm:$0xf]  ;;  %v58_v15 = vld [vmem:[#allocation2 + $0x4] sm:$0xf] }
  0x9c   :  { %v59_v16 = vmin.f32 %v56_v14, %v58_v15 }
  0x9e   :  { %v80_v18 = vmul.f32 0.01, %v59_v16 }
  0x9f   :  { %v57_v19 = vld [vmem:[#allocation3] sm:$0xf]  ;;  %v60_v20 = vld [vmem:[#allocation3 + $0x4] sm:$0xf] }
  0xa0   :  { %v61_v22 = vmax.f32 %v57_v19, %v60_v20  ;;  %v81_v23 = vadd.f32 %v80_v18, %v79_v17 }
  0xa2   :  { %v62_v24 = vsub.f32 %v61_v22, %v59_v16  ;;  %82 = vst.msk [vmem:[%s253_s7] sm:$0xf] %vm76_vm1, %v81_v23 }
  0xa4   :  { %v63_v26 = vadd.f32 1e-05, %v62_v24  ;;  %v74_v27 = vmul.f32 0.01, %v62_v24 }
  0xa6   :  { %140 = vrcp.f32 %v63_v26  ;;  %v75_v28 = vadd.f32 %v74_v27, %v73_v25 }
  0xa8   :  { %77 = vst.msk [vmem:[%s252_s6] sm:$0xf] %vm76_vm1, %v75_v28  ;;  %s169_s6 = smov [#allocation4]  }
  0xa9   :  { %s116_s7 = sshll.u32 %s169_s6, 4  ;;  %s117_s7 = int_to_ptr.vmem [resolvable:$true] %s116_s7 }
  0xaa   :  { %s142_s1 = scalar_lea.vmem %s117_s7, 256  ;;  %p147_p1 = scmp.lt.s32.totalorder %s117_s7, %s117_s7 }
  0xab   :  { %p143_p0 = scmp.ne.s32.totalorder %s117_s7, %s142_s1  ;;  %p148_p2 = scmp.lt.s32.totalorder %s142_s1, %s142_s1 }
  0xad   :  { %p149_p3 = por %p148_p2, %p147_p1 }
  0xaf   :  { %p150_p4 = pnand %p149_p3, %p143_p0 }
  0xb0   :  { %v141_v29 = vpop.eup %140 }
  0xb1   :  { %v67_v31 = vmul.f32 6.2831855, %v141_v29 }
  0xb3   :  { %v68_v32 = vmul.f32 %v67_v31, %v66_v30 }
  0xb5   :  { %v84_v34 = vrot.slane %v68_v32, 4  ;;  %v70_v35 = vmul.f32 %v68_v32, %v59_v16 }
  0xb7   :  { %v87_v36 = vsel %vm86_vm2, %v68_v32, %v84_v34  ;;  %v71_v37 = vsub.f32 %v69_v33, %v70_v35 }
  0xb8   :  { %96 = vperm.xlu1 %138, %v87_v36  }
  0xb9   :  { %v89_v38 = vrot.slane %v71_v37, 4 }
  0xbb   :  { %v91_v39 = vsel %vm86_vm2, %v71_v37, %v89_v38 }
  0xbc   :  { %103 = vperm.xlu1 %138, %v91_v39  }
 0x137   :  { %v97_v40 = vpop.permute.xlu1 %96 }
 0x138   :  { %v99_v41 = vmul.f32 %v97_v40, %v31_v0  ;;  %v100_v42 = vmul.f32 %v97_v40, %v32_v1 }
 0x13b   :  { %v104_v43 = vpop.permute.xlu1 %103 }
 0x13c   :  { %v106_v44 = vadd.f32 %v104_v43, %v99_v41  ;;  %v107_v45 = vadd.f32 %v104_v43, %v100_v42 }
 0x13e   :  { %108 = vst [vmem:[#allocation4] sm:$0xff] %v106_v44  ;;  %109 = vst [vmem:[#allocation4 + $0x8] sm:$0xff] %v107_v45 }
 0x13f   :  { %153 = shalt.err (!%p150_p4)
}
 0x140   :  { %s154_s15 = scalar_lea.hbm %s251_s5, 256 }
 0x141   :  { %p155_p5 = scmp.ne.s32.totalorder %s251_s5, %s154_s15  ;;  %p158_p6 = scmp.lt.u32.totalorder %s154_s15, %s251_s5 }
 0x143   :  { %p160_p7 = pnand %p158_p6, %p155_p5 }
 0x145   :  { %163 = shalt.err (!%p160_p7)
}
 0x146   :  { %119 = dma.vmem_to_hbm [thread:$0]  %s117_s7, 256, %s251_s5, [#allocation5]  }
 0x147   :  { %164 = dma.done.wait [#allocation5], 256  }
 0x148   :  { %165 = vsyncadd [#allocation5], 4294967040 }
 0x149   :  { %131 = vsyncpa [#allocation5], 1 }

</bundles_post_ra>
